<compile_context>
chip_gen: v7x
topology: tpu7x:2x2x1
jax: 0.10.0
libtpu: 0.0.40
codegen_flags: <defaults>
</compile_context>

<pallas_src>
import math
import functools

import jax
import jax.numpy as jnp
from jax import lax
from jax.experimental import pallas as pl
from jax.experimental.pallas import tpu as pltpu


def _attention_kernel(h_ref, mask_ref, w_ref, b_ref, out_ref, ctx_scratch,
                      *, heads_per_group, head_dim, compute_dtype):
    """One (batch, head-group) grid step.

    h_ref:       [1, S, H]      hidden states (compute_dtype)
    mask_ref:    [1, 1, S]      additive attention mask (f32)
    w_ref:       [1, H, 3*gw]   fused pre-transposed Q|K|V weights for this group
    b_ref:       [1, 1, 3*gw]   fused biases (f32); 1/sqrt(d) already folded into Q
    out_ref:     [1, 1, S, gw]  per-group context layer
    ctx_scratch: VMEM [S, gw]   f32 accumulator for a single lane-dense final store
    """
    gw = heads_per_group * head_dim
    S = h_ref.shape[1]

    h = h_ref[0]                                   # [S, H]   compute dtype
    w = w_ref[0]                                   # [H, 3gw] compute dtype

    # Fused Q/K/V projection: one MXU pass, f32 accumulation, bias added in f32.
    qkv = jnp.dot(h, w, preferred_element_type=jnp.float32) + b_ref[0]   # [S, 3gw] f32
    qkv_c = qkv.astype(compute_dtype)              # matmul operands in compute dtype

    # Broadcast the mask once (JAX does not CSE broadcast_in_dim).
    mask_b = jnp.broadcast_to(mask_ref[0], (S, S))  # [S, S] f32

    for hh in range(heads_per_group):              # small static unroll within a group
        lo = hh * head_dim
        q = qkv_c[:, lo:lo + head_dim]                        # [S, d] (pre-scaled)
        k = qkv_c[:, gw + lo:gw + lo + head_dim]              # [S, d]
        v = qkv_c[:, 2 * gw + lo:2 * gw + lo + head_dim]      # [S, d]

        # Contract on last dims: no explicit XLU transpose of K.
        scores = lax.dot_general(q, k, (((1,), (1,)), ((), ())),
                                 preferred_element_type=jnp.float32)     # [S, S] f32
        scores = scores + mask_b

        # Softmax over keys; elementwise math kept in f32 (v5e has no bf16 VPU/EUP).
        m = jnp.max(scores, axis=-1, keepdims=True)
        e = jnp.exp(scores - m)
        denom = jnp.sum(e, axis=-1, keepdims=True)
        probs = e * pl.reciprocal(denom, approx=True)                    # EUP reciprocal

        ctx = jnp.dot(probs.astype(compute_dtype), v,
                      preferred_element_type=jnp.float32)                # [S, d] f32
        ctx_scratch[:, lo:lo + head_dim] = ctx

    # Single lane-dense store of the whole group.
    out_ref[0, 0] = ctx_scratch[...].astype(out_ref.dtype)


def _heads_per_group(num_heads, head_dim):
    """Smallest divisor g of num_heads with g*head_dim >= 128 lanes (lane-dense group
    width for the output store and probs@V); otherwise put all heads in one group."""
    for g in range(1, num_heads + 1):
        if num_heads % g == 0 and g * head_dim >= 128:
            return g
    return num_heads


def bert_self_attention(hidden_states, attention_mask,
                        wq, bq, wk, bk, wv, bv,
                        *, num_heads, compute_dtype=jnp.bfloat16):
    """hidden_states: [B, S, H]; attention_mask: additive mask [B, S] (or None).
    wq/wk/wv: [H, H] PyTorch nn.Linear layout ([out, in]); bq/bk/bv: [H].
    Returns context_layer: [B, S, H] in hidden_states.dtype."""
    B, S, H = hidden_states.shape
    assert H % num_heads == 0
    head_dim = H // num_heads
    out_dtype = hidden_states.dtype

    hpg = _heads_per_group(num_heads, head_dim)
    num_groups = num_heads // hpg
    gw = hpg * head_dim

    if attention_mask is None:
        attention_mask = jnp.zeros((B, S), dtype=jnp.float32)

    inv_sqrt_d = 1.0 / math.sqrt(head_dim)

    # nn.Linear: y = x @ W.T + b. Fold 1/sqrt(d) into the query projection, regroup the
    # output columns per head-group and fuse Q|K|V into one slab per group.
    def group_cols(w_t):                 # [H, H] -> [num_groups, H, gw]
        return w_t.reshape(H, num_groups, gw).transpose(1, 0, 2)

    wq_g = group_cols(wq.T * inv_sqrt_d)
    wk_g = group_cols(wk.T)
    wv_g = group_cols(wv.T)
    w_fused = jnp.concatenate([wq_g, wk_g, wv_g], axis=-1).astype(compute_dtype)

    def group_bias(b):                   # [H] -> [num_groups, 1, gw]
        return b.reshape(num_groups, 1, gw)

    b_fused = jnp.concatenate(
        [group_bias(bq * inv_sqrt_d), group_bias(bk), group_bias(bv)],
        axis=-1).astype(jnp.float32)     # [num_groups, 1, 3*gw]

    h_in = hidden_states.astype(compute_dtype)
    mask3 = attention_mask.reshape(B, 1, S).astype(jnp.float32)

    kernel = functools.partial(_attention_kernel,
                               heads_per_group=hpg, head_dim=head_dim,
                               compute_dtype=compute_dtype)

    c_bytes = jnp.dtype(compute_dtype).itemsize
    cost = pl.CostEstimate(
        flops=int(B * (6 * S * H * H + 4 * S * S * H)),
        transcendentals=int(B * num_heads * S * S),
        bytes_accessed=int(B * S * H * c_bytes + B * S * 4
                           + 3 * H * H * c_bytes + 3 * H * 4
                           + B * S * H * jnp.dtype(out_dtype).itemsize),
    )

    # Rough per-step VMEM need (double-buffered blocks + scratch + scores) with
    # headroom; never below the 16 MiB default so tiny shapes behave as before.
    vmem_est = 4 * (2 * (S * H * c_bytes + H * 3 * gw * c_bytes + S * gw * 4)
                    + S * gw * 4 + 4 * S * S * 4)
    vmem_limit = int(min(64 * 1024 * 1024, max(vmem_est, 16 * 1024 * 1024)))

    out = pl.pallas_call(
        kernel,
        out_shape=jax.ShapeDtypeStruct((B, num_groups, S, gw), out_dtype),
        grid_spec=pltpu.PrefetchScalarGridSpec(
            num_scalar_prefetch=0,
            grid=(B, num_groups),
            in_specs=[
                pl.BlockSpec((1, S, H), lambda b, g: (b, 0, 0)),       # hidden states
                pl.BlockSpec((1, 1, S), lambda b, g: (b, 0, 0)),       # additive mask
                pl.BlockSpec((1, H, 3 * gw), lambda b, g: (g, 0, 0)),  # fused QKV weights
                pl.BlockSpec((1, 1, 3 * gw), lambda b, g: (g, 0, 0)),  # fused biases
            ],
            out_specs=pl.BlockSpec((1, 1, S, gw), lambda b, g: (b, g, 0, 0)),
            scratch_shapes=[pltpu.VMEM((S, gw), jnp.float32)],
        ),
        compiler_params=pltpu.CompilerParams(
            dimension_semantics=("parallel", "parallel"),
            vmem_limit_bytes=vmem_limit),
        cost_estimate=cost,
    )(h_in, mask3, w_fused, b_fused)

    # [B, G, S, gw] -> [B, S, G*gw] == [B, S, H]; heads inside a group are contiguous
    # columns, groups are contiguous head blocks, so this is the BERT head order.
    return out.transpose(0, 2, 1, 3).reshape(B, S, H)


def _reference(hidden_states, attention_mask, wq, bq, wk, bk, wv, bv, *, num_heads):
    B, S, H = hidden_states.shape
    d = H // num_heads

    def proj(x, w, b):
        y = x @ w.T + b                             # nn.Linear semantics
        return y.reshape(B, S, num_heads, d).transpose(0, 2, 1, 3)   # [B, nH, S, d]

    q = proj(hidden_states, wq, bq)
    k = proj(hidden_states, wk, bk)
    v = proj(hidden_states, wv, bv)
    scores = jnp.einsum("bhqd,bhkd->bhqk", q, k) / math.sqrt(d)
    scores = scores + attention_mask[:, None, None, :]
    probs = jax.nn.softmax(scores, axis=-1)
    ctx = jnp.einsum("bhqk,bhkd->bhqd", probs, v)
    return ctx.transpose(0, 2, 1, 3).reshape(B, S, H)


if __name__ == "__main__":
    B, S, H, num_heads = 2, 8, 32, 4

    key = jax.random.PRNGKey(0)
    keys = jax.random.split(key, 8)
    hidden_states = jax.random.normal(keys[0], (B, S, H), dtype=jnp.float32)
    # additive mask: 0 for valid, -10000 for masked-out key positions
    mask_bits = (jax.random.uniform(keys[1], (B, S)) > 0.2).astype(jnp.float32)
    attention_mask = (1.0 - mask_bits) * -10000.0

    scale = 0.05
    wq = scale * jax.random.normal(keys[2], (H, H), dtype=jnp.float32)
    wk = scale * jax.random.normal(keys[3], (H, H), dtype=jnp.float32)
    wv = scale * jax.random.normal(keys[4], (H, H), dtype=jnp.float32)
    bq = scale * jax.random.normal(keys[5], (H,), dtype=jnp.float32)
    bk = scale * jax.random.normal(keys[6], (H,), dtype=jnp.float32)
    bv = scale * jax.random.normal(keys[7], (H,), dtype=jnp.float32)

    ref = _reference(hidden_states, attention_mask,
                     wq, bq, wk, bk, wv, bv, num_heads=num_heads)

    # Optimized (bf16-operand) path.
    out = bert_self_attention(hidden_states, attention_mask,
                              wq, bq, wk, bk, wv, bv,
                              num_heads=num_heads, compute_dtype=jnp.bfloat16)
    out = jax.block_until_ready(out)
    assert out.shape == (B, S, H)
    assert jnp.allclose(out, ref, atol=2e-2, rtol=2e-2), "bf16 path mismatch vs reference"

    # f32 path sanity check (tighter tolerance; approx reciprocal still in play).
    out_f32 = bert_self_attention(hidden_states, attention_mask,
                                  wq, bq, wk, bk, wv, bv,
                                  num_heads=num_heads, compute_dtype=jnp.float32)
    out_f32 = jax.block_until_ready(out_f32)
    assert jnp.allclose(out_f32, ref, atol=1e-2, rtol=1e-2), "f32 path mismatch vs reference"

    print("KERNEL_OK")
</pallas_src>

<mosaic_0001>
module attributes {stable_mosaic.version = 11 : i64} {
  func.func @_attention_kernel(%arg0: i32, %arg1: i32, %arg2: memref<1x8x32xbf16, #tpu.memory_space<vmem>>, %arg3: memref<1x1x8xf32, #tpu.memory_space<vmem>>, %arg4: memref<1x32x96xbf16, #tpu.memory_space<vmem>>, %arg5: memref<1x1x96xf32, #tpu.memory_space<vmem>>, %arg6: memref<1x1x8x32xf32, #tpu.memory_space<vmem>>, %arg7: memref<8x32xf32, #tpu.memory_space<vmem>>) attributes {dimension_semantics = [#tpu.dimension_semantics<parallel>, #tpu.dimension_semantics<parallel>], iteration_bounds = array<i64: 2, 1>, scalar_prefetch = 0 : i64, scratch_operands = 1 : i64, tpu.core_type = #tpu.core_type<tc>, window_params = [{transform_indices = @transform_0, window_bounds = array<i64: 1, 8, 32>}, {transform_indices = @transform_1, window_bounds = array<i64: 1, 1, 8>}, {transform_indices = @transform_2, window_bounds = array<i64: 1, 32, 96>}, {transform_indices = @transform_3, window_bounds = array<i64: 1, 1, 96>}, {transform_indices = @transform_4, window_bounds = array<i64: 1, 1, 8, 32>}]} {
    %c0 = arith.constant 0 : index
    %c0_0 = arith.constant 0 : index
    %c0_1 = arith.constant 0 : index
    %0 = vector.load %arg2[%c0, %c0_0, %c0_1] : memref<1x8x32xbf16, #tpu.memory_space<vmem>>, vector<1x8x32xbf16>
    %1 = vector.shape_cast %0 : vector<1x8x32xbf16> to vector<8x32xbf16>
    %c0_2 = arith.constant 0 : index
    %c0_3 = arith.constant 0 : index
    %c0_4 = arith.constant 0 : index
    %2 = vector.load %arg4[%c0_2, %c0_3, %c0_4] : memref<1x32x96xbf16, #tpu.memory_space<vmem>>, vector<1x32x96xbf16>
    %3 = vector.shape_cast %2 : vector<1x32x96xbf16> to vector<32x96xbf16>
    %cst = arith.constant dense<0.000000e+00> : vector<8x96xf32>
    %4 = tpu.matmul %1, %3, %cst {dimension_numbers = #tpu.dot_dimension_numbers<[1], [0], [0], [1], [0, 0, 1, 1], [], []>} : vector<8x32xbf16>, vector<32x96xbf16>, vector<8x96xf32> -> vector<8x96xf32>
    %c0_5 = arith.constant 0 : index
    %c0_6 = arith.constant 0 : index
    %c0_7 = arith.constant 0 : index
    %5 = vector.load %arg5[%c0_5, %c0_6, %c0_7] : memref<1x1x96xf32, #tpu.memory_space<vmem>>, vector<1x1x96xf32>
    %6 = vector.shape_cast %5 : vector<1x1x96xf32> to vector<1x96xf32>
    %7 = vector.broadcast %6 : vector<1x96xf32> to vector<8x96xf32>
    %8 = arith.addf %4, %7 : vector<8x96xf32>
    %9 = arith.truncf %8 : vector<8x96xf32> to vector<8x96xbf16>
    %c0_8 = arith.constant 0 : index
    %c0_9 = arith.constant 0 : index
    %c0_10 = arith.constant 0 : index
    %10 = vector.load %arg3[%c0_8, %c0_9, %c0_10] : memref<1x1x8xf32, #tpu.memory_space<vmem>>, vector<1x1x8xf32>
    %11 = vector.shape_cast %10 : vector<1x1x8xf32> to vector<1x8xf32>
    %12 = vector.shape_cast %11 : vector<1x8xf32> to vector<1x8xf32>
    %13 = vector.broadcast %12 : vector<1x8xf32> to vector<8x8xf32>
    %14 = vector.extract_strided_slice %9 {offsets = [0, 0], sizes = [8, 8], strides = [1, 1]} : vector<8x96xbf16> to vector<8x8xbf16>
    %15 = vector.extract_strided_slice %9 {offsets = [0, 32], sizes = [8, 8], strides = [1, 1]} : vector<8x96xbf16> to vector<8x8xbf16>
    %16 = vector.extract_strided_slice %9 {offsets = [0, 64], sizes = [8, 8], strides = [1, 1]} : vector<8x96xbf16> to vector<8x8xbf16>
    %cst_11 = arith.constant dense<0.000000e+00> : vector<8x8xf32>
    %17 = tpu.matmul %14, %15, %cst_11 {dimension_numbers = #tpu.dot_dimension_numbers<[1], [1], [0], [0], [0, 0, 1, 0], [], []>} : vector<8x8xbf16>, vector<8x8xbf16>, vector<8x8xf32> -> vector<8x8xf32>
    %18 = arith.addf %17, %13 : vector<8x8xf32>
    %cst_12 = arith.constant dense<0xFF800000> : vector<8xf32>
    %19 = vector.multi_reduction <maximumf>, %18, %cst_12 [1] : vector<8x8xf32> to vector<8xf32>
    %20 = vector.shape_cast %19 : vector<8xf32> to vector<8x1xf32>
    %21 = vector.broadcast %20 : vector<8x1xf32> to vector<8x8xf32>
    %22 = arith.subf %18, %21 : vector<8x8xf32>
    %23 = math.exp %22 : vector<8x8xf32>
    %cst_13 = arith.constant dense<0.000000e+00> : vector<8xf32>
    %24 = vector.multi_reduction <add>, %23, %cst_13 [1] : vector<8x8xf32> to vector<8xf32>
    %25 = vector.shape_cast %24 : vector<8xf32> to vector<8x1xf32>
    %26 = tpu.reciprocal %25 {approx = true} : vector<8x1xf32> -> vector<8x1xf32>
    %27 = vector.broadcast %26 : vector<8x1xf32> to vector<8x8xf32>
    %28 = arith.mulf %23, %27 : vector<8x8xf32>
    %29 = arith.truncf %28 : vector<8x8xf32> to vector<8x8xbf16>
    %cst_14 = arith.constant dense<0.000000e+00> : vector<8x8xf32>
    %30 = tpu.matmul %29, %16, %cst_14 {dimension_numbers = #tpu.dot_dimension_numbers<[1], [0], [0], [1], [0, 0, 1, 1], [], []>} : vector<8x8xbf16>, vector<8x8xbf16>, vector<8x8xf32> -> vector<8x8xf32>
    %c0_15 = arith.constant 0 : index
    %c0_16 = arith.constant 0 : index
    %31 = vector.load %arg7[%c0_15, %c0_16] : memref<8x32xf32, #tpu.memory_space<vmem>>, vector<8x8xf32>
    tpu.vector_store %arg7[%c0_15, %c0_16], %30 {strides = array<i32>} : memref<8x32xf32, #tpu.memory_space<vmem>>, vector<8x8xf32>,
    %32 = vector.extract_strided_slice %9 {offsets = [0, 8], sizes = [8, 8], strides = [1, 1]} : vector<8x96xbf16> to vector<8x8xbf16>
    %33 = vector.extract_strided_slice %9 {offsets = [0, 40], sizes = [8, 8], strides = [1, 1]} : vector<8x96xbf16> to vector<8x8xbf16>
    %34 = vector.extract_strided_slice %9 {offsets = [0, 72], sizes = [8, 8], strides = [1, 1]} : vector<8x96xbf16> to vector<8x8xbf16>
    %cst_17 = arith.constant dense<0.000000e+00> : vector<8x8xf32>
    %35 = tpu.matmul %32, %33, %cst_17 {dimension_numbers = #tpu.dot_dimension_numbers<[1], [1], [0], [0], [0, 0, 1, 0], [], []>} : vector<8x8xbf16>, vector<8x8xbf16>, vector<8x8xf32> -> vector<8x8xf32>
    %36 = arith.addf %35, %13 : vector<8x8xf32>
    %cst_18 = arith.constant dense<0xFF800000> : vector<8xf32>
    %37 = vector.multi_reduction <maximumf>, %36, %cst_18 [1] : vector<8x8xf32> to vector<8xf32>
    %38 = vector.shape_cast %37 : vector<8xf32> to vector<8x1xf32>
    %39 = vector.broadcast %38 : vector<8x1xf32> to vector<8x8xf32>
    %40 = arith.subf %36, %39 : vector<8x8xf32>
    %41 = math.exp %40 : vector<8x8xf32>
    %cst_19 = arith.constant dense<0.000000e+00> : vector<8xf32>
    %42 = vector.multi_reduction <add>, %41, %cst_19 [1] : vector<8x8xf32> to vector<8xf32>
    %43 = vector.shape_cast %42 : vector<8xf32> to vector<8x1xf32>
    %44 = tpu.reciprocal %43 {approx = true} : vector<8x1xf32> -> vector<8x1xf32>
    %45 = vector.broadcast %44 : vector<8x1xf32> to vector<8x8xf32>
    %46 = arith.mulf %41, %45 : vector<8x8xf32>
    %47 = arith.truncf %46 : vector<8x8xf32> to vector<8x8xbf16>
    %cst_20 = arith.constant dense<0.000000e+00> : vector<8x8xf32>
    %48 = tpu.matmul %47, %34, %cst_20 {dimension_numbers = #tpu.dot_dimension_numbers<[1], [0], [0], [1], [0, 0, 1, 1], [], []>} : vector<8x8xbf16>, vector<8x8xbf16>, vector<8x8xf32> -> vector<8x8xf32>
    %c0_21 = arith.constant 0 : index
    %c8 = arith.constant 8 : index
    %49 = vector.load %arg7[%c0_21, %c8] : memref<8x32xf32, #tpu.memory_space<vmem>>, vector<8x8xf32>
    tpu.vector_store %arg7[%c0_21, %c8], %48 {strides = array<i32>} : memref<8x32xf32, #tpu.memory_space<vmem>>, vector<8x8xf32>,
    %50 = vector.extract_strided_slice %9 {offsets = [0, 16], sizes = [8, 8], strides = [1, 1]} : vector<8x96xbf16> to vector<8x8xbf16>
    %51 = vector.extract_strided_slice %9 {offsets = [0, 48], sizes = [8, 8], strides = [1, 1]} : vector<8x96xbf16> to vector<8x8xbf16>
    %52 = vector.extract_strided_slice %9 {offsets = [0, 80], sizes = [8, 8], strides = [1, 1]} : vector<8x96xbf16> to vector<8x8xbf16>
    %cst_22 = arith.constant dense<0.000000e+00> : vector<8x8xf32>
    %53 = tpu.matmul %50, %51, %cst_22 {dimension_numbers = #tpu.dot_dimension_numbers<[1], [1], [0], [0], [0, 0, 1, 0], [], []>} : vector<8x8xbf16>, vector<8x8xbf16>, vector<8x8xf32> -> vector<8x8xf32>
    %54 = arith.addf %53, %13 : vector<8x8xf32>
    %cst_23 = arith.constant dense<0xFF800000> : vector<8xf32>
    %55 = vector.multi_reduction <maximumf>, %54, %cst_23 [1] : vector<8x8xf32> to vector<8xf32>
    %56 = vector.shape_cast %55 : vector<8xf32> to vector<8x1xf32>
    %57 = vector.broadcast %56 : vector<8x1xf32> to vector<8x8xf32>
    %58 = arith.subf %54, %57 : vector<8x8xf32>
    %59 = math.exp %58 : vector<8x8xf32>
    %cst_24 = arith.constant dense<0.000000e+00> : vector<8xf32>
    %60 = vector.multi_reduction <add>, %59, %cst_24 [1] : vector<8x8xf32> to vector<8xf32>
    %61 = vector.shape_cast %60 : vector<8xf32> to vector<8x1xf32>
    %62 = tpu.reciprocal %61 {approx = true} : vector<8x1xf32> -> vector<8x1xf32>
    %63 = vector.broadcast %62 : vector<8x1xf32> to vector<8x8xf32>
    %64 = arith.mulf %59, %63 : vector<8x8xf32>
    %65 = arith.truncf %64 : vector<8x8xf32> to vector<8x8xbf16>
    %cst_25 = arith.constant dense<0.000000e+00> : vector<8x8xf32>
    %66 = tpu.matmul %65, %52, %cst_25 {dimension_numbers = #tpu.dot_dimension_numbers<[1], [0], [0], [1], [0, 0, 1, 1], [], []>} : vector<8x8xbf16>, vector<8x8xbf16>, vector<8x8xf32> -> vector<8x8xf32>
    %c0_26 = arith.constant 0 : index
    %c16 = arith.constant 16 : index
    %67 = vector.load %arg7[%c0_26, %c16] : memref<8x32xf32, #tpu.memory_space<vmem>>, vector<8x8xf32>
    tpu.vector_store %arg7[%c0_26, %c16], %66 {strides = array<i32>} : memref<8x32xf32, #tpu.memory_space<vmem>>, vector<8x8xf32>,
    %68 = vector.extract_strided_slice %9 {offsets = [0, 24], sizes = [8, 8], strides = [1, 1]} : vector<8x96xbf16> to vector<8x8xbf16>
    %69 = vector.extract_strided_slice %9 {offsets = [0, 56], sizes = [8, 8], strides = [1, 1]} : vector<8x96xbf16> to vector<8x8xbf16>
    %70 = vector.extract_strided_slice %9 {offsets = [0, 88], sizes = [8, 8], strides = [1, 1]} : vector<8x96xbf16> to vector<8x8xbf16>
    %cst_27 = arith.constant dense<0.000000e+00> : vector<8x8xf32>
    %71 = tpu.matmul %68, %69, %cst_27 {dimension_numbers = #tpu.dot_dimension_numbers<[1], [1], [0], [0], [0, 0, 1, 0], [], []>} : vector<8x8xbf16>, vector<8x8xbf16>, vector<8x8xf32> -> vector<8x8xf32>
    %72 = arith.addf %71, %13 : vector<8x8xf32>
    %cst_28 = arith.constant dense<0xFF800000> : vector<8xf32>
    %73 = vector.multi_reduction <maximumf>, %72, %cst_28 [1] : vector<8x8xf32> to vector<8xf32>
    %74 = vector.shape_cast %73 : vector<8xf32> to vector<8x1xf32>
    %75 = vector.broadcast %74 : vector<8x1xf32> to vector<8x8xf32>
    %76 = arith.subf %72, %75 : vector<8x8xf32>
    %77 = math.exp %76 : vector<8x8xf32>
    %cst_29 = arith.constant dense<0.000000e+00> : vector<8xf32>
    %78 = vector.multi_reduction <add>, %77, %cst_29 [1] : vector<8x8xf32> to vector<8xf32>
    %79 = vector.shape_cast %78 : vector<8xf32> to vector<8x1xf32>
    %80 = tpu.reciprocal %79 {approx = true} : vector<8x1xf32> -> vector<8x1xf32>
    %81 = vector.broadcast %80 : vector<8x1xf32> to vector<8x8xf32>
    %82 = arith.mulf %77, %81 : vector<8x8xf32>
    %83 = arith.truncf %82 : vector<8x8xf32> to vector<8x8xbf16>
    %cst_30 = arith.constant dense<0.000000e+00> : vector<8x8xf32>
    %84 = tpu.matmul %83, %70, %cst_30 {dimension_numbers = #tpu.dot_dimension_numbers<[1], [0], [0], [1], [0, 0, 1, 1], [], []>} : vector<8x8xbf16>, vector<8x8xbf16>, vector<8x8xf32> -> vector<8x8xf32>
    %c0_31 = arith.constant 0 : index
    %c24 = arith.constant 24 : index
    %85 = vector.load %arg7[%c0_31, %c24] : memref<8x32xf32, #tpu.memory_space<vmem>>, vector<8x8xf32>
    tpu.vector_store %arg7[%c0_31, %c24], %84 {strides = array<i32>} : memref<8x32xf32, #tpu.memory_space<vmem>>, vector<8x8xf32>,
    %c0_32 = arith.constant 0 : index
    %c0_33 = arith.constant 0 : index
    %86 = vector.load %arg7[%c0_32, %c0_33] : memref<8x32xf32, #tpu.memory_space<vmem>>, vector<8x32xf32>
    %c0_34 = arith.constant 0 : index
    %c0_35 = arith.constant 0 : index
    %c0_36 = arith.constant 0 : index
    %c0_37 = arith.constant 0 : index
    %87 = vector.load %arg6[%c0_34, %c0_35, %c0_36, %c0_37] : memref<1x1x8x32xf32, #tpu.memory_space<vmem>>, vector<1x1x8x32xf32>
    %88 = vector.shape_cast %87 : vector<1x1x8x32xf32> to vector<8x32xf32>
    %89 = vector.shape_cast %86 : vector<8x32xf32> to vector<1x1x8x32xf32>
    tpu.vector_store %arg6[%c0_34, %c0_35, %c0_36, %c0_37], %89 {strides = array<i32>} : memref<1x1x8x32xf32, #tpu.memory_space<vmem>>, vector<1x1x8x32xf32>,
    return
  }
  func.func @transform_0(%arg0: i32, %arg1: i32) -> (i32, i32, i32) {
    %c0_i32 = arith.constant 0 : i32
    %c0_i32_0 = arith.constant 0 : i32
    %c0_i32_1 = arith.constant 0 : i32
    return %arg0, %c0_i32, %c0_i32_0 : i32, i32, i32
  }
  func.func @transform_1(%arg0: i32, %arg1: i32) -> (i32, i32, i32) {
    %c0_i32 = arith.constant 0 : i32
    %c0_i32_0 = arith.constant 0 : i32
    %c0_i32_1 = arith.constant 0 : i32
    return %arg0, %c0_i32, %c0_i32_0 : i32, i32, i32
  }
  func.func @transform_2(%arg0: i32, %arg1: i32) -> (i32, i32, i32) {
    %c0_i32 = arith.constant 0 : i32
    %c0_i32_0 = arith.constant 0 : i32
    %c0_i32_1 = arith.constant 0 : i32
    return %arg1, %c0_i32, %c0_i32_0 : i32, i32, i32
  }
  func.func @transform_3(%arg0: i32, %arg1: i32) -> (i32, i32, i32) {
    %c0_i32 = arith.constant 0 : i32
    %c0_i32_0 = arith.constant 0 : i32
    %c0_i32_1 = arith.constant 0 : i32
    return %arg1, %c0_i32, %c0_i32_0 : i32, i32, i32
  }
  func.func @transform_4(%arg0: i32, %arg1: i32) -> (i32, i32, i32, i32) {
    %c0_i32 = arith.constant 0 : i32
    %c0_i32_0 = arith.constant 0 : i32
    %c0_i32_1 = arith.constant 0 : i32
    return %arg0, %arg1, %c0_i32, %c0_i32_0 : i32, i32, i32, i32
  }
}

</mosaic_0001>

<bundles_post_ra>
// kernel: tpu_custom_call.1
= control target key start
LH: loop header
LB: loop body
LE: loop exit
PB: predicated region body
PF: predicated region fallthrough
CT: control target
= control target key end

     0   :  { %9 = vsyncpa [#allocation4], 0  ;;  %s1641_s0 = inlined_call_operand.hbm [shape: bf16[2,8,32], index: 0, kind: input, shape index: {}]   ;;  %s1642_s1 = inlined_call_operand.vmem [shape: f32[2,1,8], index: 1, kind: input, shape index: {}]   ;;  %s1643_s2 = inlined_call_operand.hbm [shape: bf16[1,32,96], index: 2, kind: input, shape index: {}]   ;;  %s1644_s3 = inlined_call_operand.vmem [shape: f32[1,1,96], index: 3, kind: input, shape index: {}]   ;;  %s1645_s4 = inlined_call_operand.hbm [shape: f32[2,1,8,32], index: 4, kind: output, shape index: {}]  }
   0x1   :  { %11 = vsyncpa [#allocation4 + $0x1], 0 }
   0x2   :  { %12 = vsyncpa [#allocation7], 0 }
   0x3   :  { %13 = vsyncpa [#allocation5], 0 }
   0x4   :  { %15 = vsyncpa [#allocation5 + $0x1], 0  ;;  %s1349_s15 = smov 0   ;;  %s1351_s16 = smov 0  }
   0x5   :  { %s1353_s17 = smov 0   ;;  %s1355_s18 = smov 0  }
   0x6   :  { %s1357_s19 = smov 0   ;;  %s1359_s20 = smov 0  }
   0x7 LB: > { %s944_s21 = sadd.s32 4294967295, %s1301_s20   ;;  %s945_s22 = sadd.s32 4294967294, %s1301_s20   ;;  %s1301_s20 = sphi %s1359_s20, %s21_s20   ;;  %s1297_s19 = sphi %s1357_s19, %s1669_s19   ;;  %s1293_s18 = sphi %s1355_s18, %s1668_s18   ;;  %s1289_s17 = sphi %s1353_s17, %s1667_s17   ;;  %s1285_s16 = sphi %s1351_s16, %s1666_s16   ;;  %s1281_s15 = sphi %s1349_s15, %s1665_s15  }
   0x8   : > { %p53_p0 = scmp.ne.s32.totalorder %s1285_s16, %s1281_s15  ;;  %p1383_p1 = scmp.eq.s32.totalorder %s944_s21, 0 }
   0x9   : > { %p1387_p2 = scmp.eq.s32.totalorder %s944_s21, 1  ;;  %p163_p3 = scmp.eq.s32.totalorder %s945_s22, 1 }
   0xa   : > { %s1650_s23 = scalar_select %p1383_p1, 1, 0 }
   0xb   : > { %s1651_s24 = scalar_select %p1387_p2, 1, 0 }
   0xc   : > { %p1393_p4 = por %p1383_p1, %p53_p0  ;;  %p946_p5 = scmp.ge.s32.totalorder %s1301_s20, 1 }
   0xd   : > { %p1398_p6 = por %p163_p3, %p53_p0  ;;  %p170_p7 = scmp.lt.s32.totalorder %s1301_s20, 3 }
   0xe   : > { %s1652_s25 = scalar_select %p1393_p4, 1, 0 }
   0xf   : > { %s1653_s26 = scalar_select %p1398_p6, 1, 0 }
  0x10   : > { %p1403_p8 = pnand %p946_p5, %p170_p7  ;;  %s1303_s28 = smov [#allocation6]  }
  0x11   : > { %s185_s29 = sshll.u32 %s1303_s28, 4  ;;  %s33_s5 = sadd.s32 1, %s1297_s19  ;;  %s186_s29 = int_to_ptr.vmem [resolvable:$true] %s185_s29 }
  0x12   : > { %s1654_s27 = scalar_select %p1403_p8, 1, 0 }
  0x13   : > { %p1056_p9 = pneg %p1403_p8  ;;  %s1157_s8 = scalar_lea.hbm %s1643_s2, 256 }
  0x14   : > { %p1158_p12 = scmp.ne.s32.totalorder %s1643_s2, %s1157_s8  ;;  %p1164_p5 = scmp.lt.u32.totalorder %s1157_s8, %s1643_s2 }
  0x15   : > { %p1412_p11 = pnand %p1056_p9, %p1383_p1 }
  0x17   : > { %p1159_p13 = pneg %p1412_p11 }
  0x19   : > { %p1160_p0 = pnand %p1159_p13, %p1158_p12 }
  0x1b   : > { %p1161_p3 = pneg %p1160_p0 }
  0x1d   : > { %p1166_p7 = pnand %p1164_p5, %p1161_p3 }
  0x1f   : > { %1169 = shalt.err (!%p1166_p7)
}
  0x20   : > { %s1170_s13 = scalar_lea.vmem %s186_s29, 256  ;;  %p1178_p1 = scmp.lt.s32.totalorder %s186_s29, %s186_s29 }
  0x21   : > { %p1171_p9 = scmp.ne.s32.totalorder %s186_s29, %s1170_s13  ;;  %p1179_p4 = scmp.lt.s32.totalorder %s1170_s13, %s1170_s13 }
  0x23   : > { %p1173_p10 = pnand %p1171_p9, %p1159_p13  ;;  %p1180_p8 = por %p1179_p4, %p1178_p1 }
  0x25   : > { %p1174_p6 = pneg %p1173_p10 }
  0x27   : > { %p1181_p2 = pnand %p1180_p8, %p1174_p6 }
  0x29   : > { %1184 = shalt.err (!%p1181_p2)
}
  0x2a   : > { %s1304_s14 = smov 64   ;;  %s1305_s21 = smov 4  }
  0x2b   : > { %1059 = dma.hbm_to_vmem [thread:$0]  (!%p1412_p11), %s1643_s2, 256, %s186_s29, [#allocation7], %s1304_s14, %s1304_s14, %s1305_s21  }
  0x2c   : > { %p35_p1 = scmp.ge.s32.totalorder %s33_s5, 2  ;;  %s40_s6 = sadd.s32 1, %s1289_s17 }
  0x2d   : > { %p47_p2 = scmp.ne.s32.totalorder %s1289_s17, %s1285_s16  ;;  %p48_p4 = scmp.eq.s32.totalorder %s1301_s20, 0 }
  0x2e   : > { %s1671_s5 = smov (%p35_p1, %s33_s5), 0  ;;  %p1657_p8 = scmp.ne.s32.totalorder %s1651_s24, 0 }
  0x2f   : > { %p1439_p6 = por %p48_p4, %p47_p2  ;;  %s37_s30 = ssub.s32 %s1297_s19, %s1671_s5 }
  0x30   : > { %p1445_p10 = por %p1657_p8, %p47_p2  ;;  %p1069_p12 = scmp.lt.s32.totalorder %s1301_s20, 2 }
  0x31   : > { %p38_p11 = scmp.eq.s32.totalorder %s37_s30, 0  ;;  %s205_s29 = sand.u32 1, %s1289_s17  }
  0x32   : > { %s950_s9 = sshll.u32 %s205_s29, 2  ;;  %s951_s11 = sshll.u32 %s1297_s19, 6 }
  0x33   : > { %s1454_s10 = scalar_select %p38_p11, %s1289_s17, %s40_s6  }
  0x34   : > { %s1460_s14 = scalar_lea.hbm %s1641_s0, %s951_s11  ;;  %s209_s24 = scalar_lea.vmem [#allocation3], %s950_s9 }
  0x35   : > { %s216_s21 = sshll.u32 %s209_s24, 4  ;;  %p1466_p13 = pnand %p1069_p12, %p1439_p6  ;;  %s1462_s21 = int_to_ptr.vmem [resolvable:$true] %s216_s21 }
  0x36   : > { %s206_s28 = scalar_lea.sflag [#allocation4], %s205_s29  ;;  %s1185_s6 = scalar_lea.hbm %s1460_s14, 64 }
  0x37   : > { %p1186_p0 = scmp.ne.s32.totalorder %s1460_s14, %s1185_s6  ;;  %p1187_p3 = pneg %p1466_p13 }
  0x38   : > { %s1190_s11 = scalar_lea.hbm %s1641_s0, 128  ;;  %p1191_p9 = scmp.lt.u32.totalorder %s1460_s14, %s1641_s0 }
  0x39   : > { %p1188_p5 = pnand %p1187_p3, %p1186_p0  ;;  %p1192_p1 = scmp.lt.u32.totalorder %s1190_s11, %s1185_s6 }
  0x3a   : > { %p1194_p4 = scmp.lt.u32.totalorder %s1185_s6, %s1460_s14 }
  0x3b   : > { %p1189_p7 = pneg %p1188_p5  ;;  %p1193_p2 = por %p1192_p1, %p1191_p9 }
  0x3d   : > { %p1195_p6 = por %p1194_p4, %p1193_p2 }
  0x3f   : > { %p1196_p8 = pnand %p1195_p6, %p1189_p7 }
  0x41   : > { %1199 = shalt.err (!%p1196_p8)
}
  0x42   : > { %s1200_s29 = scalar_lea.vmem %s1462_s21, 64  ;;  %s1306_s13 = smov [#allocation3]  }
  0x43   : > { %p1201_p12 = scmp.ne.s32.totalorder %s1462_s21, %s1200_s29  ;;  %s1205_s24 = sshll.u32 %s1306_s13, 4  ;;  %s1206_s24 = int_to_ptr.vmem [resolvable:$false] %s1205_s24 }
  0x44   : > { %s1207_s30 = scalar_lea.vmem %s1206_s24, 128  ;;  %p1208_p5 = scmp.lt.s32.totalorder %s1462_s21, %s1206_s24 }
  0x45   : > { %p1203_p11 = pnand %p1201_p12, %p1187_p3  ;;  %p1209_p9 = scmp.lt.s32.totalorder %s1207_s30, %s1200_s29 }
  0x47   : > { %p1204_p0 = pneg %p1203_p11  ;;  %p1210_p1 = por %p1209_p9, %p1208_p5 }
  0x49   : > { %p1211_p2 = pnand %p1210_p1, %p1204_p0 }
  0x4b   : > { %1214 = shalt.err (!%p1211_p2)
}
  0x4c   : > { %1063 = dma.hbm_to_vmem [thread:$0]  (!%p1466_p13), %s1460_s14, 64, %s1462_s21, %s206_s28  }
  0x4d   : > { %p1660_p7 = scmp.ne.s32.totalorder %s1654_s27, 0 }
  0x4e   : > { %s1498_s6 = sand.u32 (!%p1660_p7), 1, %s1285_s16   ;;  %p1661_p3 = scmp.ne.s32.totalorder (!%p1660_p7), %s1652_s25, 0 }
  0x4f   : > { %231 = sbr.rel (%p1660_p7) target bundleno = 1380 (0x564), region = 36  ;;  %s953_s9 = sshll.u32 (!%p1660_p7), %s1498_s6, 2 }
  0x50   : > { %s234_s11 = scalar_lea.sflag (!%p1660_p7), [#allocation4], %s1498_s6  ;;  %s237_s7 = scalar_lea.vmem (!%p1660_p7), [#allocation3], %s953_s9 }
  0x56   : > { %1268 = dma.done.wait (%p1661_p3), %s234_s11, 64  }
  0x57   : > { %1270 = vsyncadd (%p1661_p3), %s234_s11, 4294967232  ;;  %p1662_p4 = scmp.ne.s32.totalorder %s1650_s23, 0 }
  0x59   : > { %1272 = dma.done.wait (%p1662_p4), [#allocation7], 256  }
  0x5a   : > { %1274 = vsyncadd (%p1662_p4), [#allocation7], 4294967040  ;;  %v1307_v0 = vmov 0.0   ;;  %vm1308_vm0 = vmmov 0   ;;  %v1139_v1 = vld [vmem:[#allocation6] sm:$0xff]   ;;  %v1140_v2 = vld [vmem:[#allocation6 + $0x8] sm:$0xff]  }
  0x5b   : > { %992 = vmatprep.subr.bf16.mxu0 %v1307_v0  ;;  %996 = vmatprep.mubr.msk.bf16.mxu0 %vm1308_vm0, %v1307_v0  ;;  %v279_v3 = vld [vmem:[%s237_s7] sm:$0xf]  ;;  %vm303_vm1 = vcmask 261120   ;;  %v956_v4 = vld [vmem:[%s1644_s3] ss:$0 sm:$0xff]  ;;  %s1309_s27 = smov 120  }
  0x5c   : > { %1000 = vmatprep.subr.bf16.mxu1 %v1307_v0  ;;  %1002 = vmatprep.mubr.msk.bf16.mxu1 %vm1308_vm0, %v1307_v0  ;;  %s1310_s14 = smov 96   ;;  %s1311_s21 = smov 80   ;;  %vm358_vm2 = vcmask 64512   ;;  %vm422_vm3 = vcmask 1043456   ;;  %vm581_vm4 = vcmask 130112   ;;  %vm697_vm5 = vcmask 195712  }
  0x5d   : > { %993 = vmatpush3.bf16.msra.mxu0 %v1139_v1  ;;  %s1312_s22 = smov 88   ;;  %s1313_s28 = smov 72   ;;  %vm813_vm6 = vcmask 261312  }
  0x5e   : > { %994 = vmatprep.subr.bf16.mxu0 %v1307_v0  ;;  %s1314_s12 = smov 112   ;;  %s1315_s29 = smov 104  }
  0x5f   : > { %p272_p13 = scmp.lt.s32.totalorder %s1293_s18, 1  ;;  %s1316_s11 = smov 56  }
  0x60   : > { %s1317_s7 = smov 64   ;;  %s1318_s23 = smov 40  }
  0x61   : > { %995 = vmatpush3.bf16.msra.mxu0 %v1140_v2  ;;  %s273_s13 = scalar_select %p272_p13, %s1293_s18, 1 }
  0x62   : > { %1006 = vmatprep.subr.bf16.mxu0 %v1307_v0  ;;  %s1319_s25 = smov 48  }
  0x63   : > { %s274_s9 = scalar_lea.vmem %s1642_s1, %s273_s13 }
  0x64   : > { %997 = vmatmul.mubr.msk.bf16.vlgmr.msra.gmra.mrb[0].mxu0 %vm303_vm1, %v279_v3  ;;  %v960_v22 = vld [vmem:[%s274_s9] ss:$0 sm:$0xff]  ;;  %s818_s9 = scalar_lea.sflag [#allocation5], %s1498_s6 }
  0x65   : > { %1008 = vmatprep.mubr.msk.bf16.mxu0 %vm1308_vm0, %v1307_v0 }
 0x137   : > { %v341_v5 = vpop.f32.mrb[0].mxu0 }
 0x138   : > { %v342_v6 = vadd.f32 %v956_v4, %v341_v5  ;;  %v998_v7 = vpop.f32.mrb[1].mxu0 }
 0x139   : > { %v344_v8 = vpop.f32.mrb[2].mxu0 }
 0x13a   : > { %v1524_v9 = vpack.c.bf16 %v342_v6, %v342_v6  ;;  %v999_v10 = vpop.f32.mrb[3].mxu0 }
 0x13c   : > { %467 = vrot.lane.b32.xlu1 %v1524_v9, %s1309_s27  ;;  %356 = vrot.lane.b32.xlu0 %v1524_v9, %s1310_s14  ;;  %s1320_s27 = smov 8   ;;  %s1321_s14 = smov 16  }
 0x140   : > { %585 = vrot.lane.b32.xlu1 %v1524_v9, %s1311_s21  ;;  %469 = vrot.lane.b32.xlu0 %v1524_v9, %s1312_s22  ;;  %s1322_s21 = smov 24   ;;  %s955_s22 = sshll.u32 %s1498_s6, 3 }
 0x144   : > { %701 = vrot.lane.b32.xlu1 %v1524_v9, %s1313_s28  ;;  %583 = vrot.lane.b32.xlu0 %v1524_v9, %s1314_s12  ;;  %s970_s28 = sshll.u32 %s1293_s18, 7  ;;  %s271_s12 = scalar_lea.vmem [#allocation8], %s955_s22 }
 0x145   : > { %s1591_s30 = scalar_lea.hbm %s1645_s4, %s970_s28  ;;  %s1323_s18 = smov [#allocation8]  }
 0x148   : > { %699 = vrot.lane.b32.xlu0 %v1524_v9, %s1315_s29  ;;  %s832_s29 = sshll.u32 %s271_s12, 4  ;;  %s1593_s29 = int_to_ptr.vmem [resolvable:$true] %s832_s29 }
 0x1ae   : > { %v357_v11 = vpop.permute.xlu0 %356  ;;  %v468_v14 = vpop.permute.xlu1 %467 }
 0x1af   : > { %v363_v12 = vsel %vm358_vm2, %v357_v11, 0 }
 0x1b0   : > { %1001 = vmatpush3.bf16.xpose.msra.mxu1 %v363_v12 }
 0x1b1   : > { %1012 = vmatprep.subr.bf16.mxu1 %v1307_v0 }
 0x1b2   : > { %v470_v13 = vpop.permute.xlu0 %469  ;;  %v586_v16 = vpop.permute.xlu1 %585 }
 0x1b3   : > { %v475_v15 = vsel %vm358_vm2, %v470_v13, 0  ;;  %v591_v17 = vsel %vm358_vm2, %v586_v16, 0 }
 0x1b6   : > { %v702_v18 = vpop.permute.xlu1 %701  ;;  %v584_v19 = vpop.permute.xlu0 %583 }
 0x1b7   : > { %1003 = vmatmul.mubr.msk.bf16.vlgmr.msra.gmra.mrb[0].mxu1 %vm358_vm2, %v1524_v9  ;;  %v707_v20 = vsel %vm358_vm2, %v702_v18, 0 }
 0x1b8   : > { %1013 = vmatpush3.bf16.xpose.msra.mxu1 %v475_v15  ;;  %1014 = vmatprep.mubr.msk.bf16.mxu1 %vm1308_vm0, %v1307_v0 }
 0x1b9   : > { %1024 = vmatprep.subr.bf16.mxu1 %v1307_v0 }
 0x1ba   : > { %v700_v21 = vpop.permute.xlu0 %699 }
 0x1bf   : > { %1015 = vmatmul.mubr.msk.bf16.vlgmr.msra.gmra.mrb[4].mxu1 %vm358_vm2, %v468_v14 }
 0x1c0   : > { %1025 = vmatpush3.bf16.xpose.msra.mxu1 %v591_v17  ;;  %1026 = vmatprep.mubr.msk.bf16.mxu1 %vm1308_vm0, %v1307_v0 }
 0x1c1   : > { %1036 = vmatprep.subr.bf16.mxu1 %v1307_v0 }
 0x1c7   : > { %1027 = vmatmul.mubr.msk.bf16.vlgmr.msra.gmra.mrb[8].mxu1 %vm358_vm2, %v584_v19 }
 0x1c8   : > { %1037 = vmatpush3.bf16.xpose.msra.mxu1 %v707_v20  ;;  %1038 = vmatprep.mubr.msk.bf16.mxu1 %vm1308_vm0, %v1307_v0 }
 0x1cf   : > { %1039 = vmatmul.mubr.msk.bf16.vlgmr.msra.gmra.mrb[12].mxu1 %vm358_vm2, %v700_v21 }
 0x28a   : > { %v399_v23 = vpop.f32.mrb[0].mxu1 }
 0x28b   : > { %v400_v24 = vadd.f32 %v960_v22, %v399_v23  ;;  %v1004_v25 = vpop.f32.mrb[1].mxu1 }
 0x28c   : > { %v402_v26 = vpop.f32.mrb[2].mxu1 }
 0x28d   : > { %v1005_v27 = vpop.f32.mrb[3].mxu1  ;;  %v405_v28 = vsel %vm358_vm2, %v400_v24, -inf }
 0x28e   : > { %406 = vmax.xlane.f32.xlu1 %v405_v28 }
 0x292   : > { %v511_v29 = vpop.f32.mrb[4].mxu1 }
 0x293   : > { %v512_v30 = vadd.f32 %v960_v22, %v511_v29  ;;  %v1016_v31 = vpop.f32.mrb[5].mxu1 }
 0x294   : > { %v514_v32 = vpop.f32.mrb[6].mxu1 }
 0x295   : > { %v1017_v33 = vpop.f32.mrb[7].mxu1  ;;  %v517_v34 = vsel %vm358_vm2, %v512_v30, -inf }
 0x296   : > { %518 = vmax.xlane.f32.xlu0 %v517_v34 }
 0x29a   : > { %v627_v35 = vpop.f32.mrb[8].mxu1 }
 0x29b   : > { %v628_v36 = vadd.f32 %v960_v22, %v627_v35  ;;  %v1028_v37 = vpop.f32.mrb[9].mxu1 }
 0x29c   : > { %v630_v38 = vpop.f32.mrb[10].mxu1 }
 0x29d   : > { %v1029_v39 = vpop.f32.mrb[11].mxu1  ;;  %v633_v40 = vsel %vm358_vm2, %v628_v36, -inf }
 0x29e   : > { %634 = vmax.xlane.f32.xlu0 %v633_v40 }
 0x2a2   : > { %v743_v41 = vpop.f32.mrb[12].mxu1 }
 0x2a3   : > { %v744_v42 = vadd.f32 %v960_v22, %v743_v41  ;;  %v1040_v43 = vpop.f32.mrb[13].mxu1 }
 0x2a4   : > { %v746_v44 = vpop.f32.mrb[14].mxu1 }
 0x2a5   : > { %v1041_v45 = vpop.f32.mrb[15].mxu1  ;;  %v749_v46 = vsel %vm358_vm2, %v744_v42, -inf }
 0x2a6   : > { %750 = vmax.xlane.f32.xlu1 %v749_v46 }
 0x31b   : > { %v407_v47 = vpop.xlane.xlu1 %406 }
 0x31c   : > { %v408_v48 = vsub.f32 %v400_v24, %v407_v47 }
 0x31e   : > { %v409_v49 = vmul.f32 1.442695, %v408_v48 }
 0x320   : > { %1141 = vpow2.f32 %v409_v49 }
 0x323   : > { %v519_v50 = vpop.xlane.xlu0 %518 }
 0x324   : > { %v520_v51 = vsub.f32 %v512_v30, %v519_v50 }
 0x326   : > { %v521_v52 = vmul.f32 1.442695, %v520_v51 }
 0x328   : > { %1143 = vpow2.f32 %v521_v52 }
 0x32a   : > { %v1142_v53 = vpop.eup %1141 }
 0x32b   : > { %v635_v54 = vpop.xlane.xlu0 %634  ;;  %v411_v55 = vsel %vm358_vm2, %v1142_v53, 0.0 }
 0x32c   : > { %v636_v56 = vsub.f32 %v628_v36, %v635_v54  ;;  %412 = vadd.xlane.f32.xlu0 %v411_v55 }
 0x32e   : > { %v637_v57 = vmul.f32 1.442695, %v636_v56 }
 0x330   : > { %1145 = vpow2.f32 %v637_v57 }
 0x332   : > { %v1144_v58 = vpop.eup %1143 }
 0x333   : > { %v523_v59 = vsel %vm358_vm2, %v1144_v58, 0.0  ;;  %v751_v62 = vpop.xlane.xlu1 %750 }
 0x334   : > { %524 = vadd.xlane.f32.xlu1 %v523_v59  ;;  %v752_v63 = vsub.f32 %v744_v42, %v751_v62 }
 0x336   : > { %v753_v1 = vmul.f32 1.442695, %v752_v63 }
 0x338   : > { %1147 = vpow2.f32 %v753_v1 }
 0x33a   : > { %v1146_v60 = vpop.eup %1145 }
 0x33b   : > { %v639_v61 = vsel %vm358_vm2, %v1146_v60, 0.0 }
 0x33c   : > { %640 = vadd.xlane.f32.xlu0 %v639_v61 }
 0x342   : > { %v1148_v2 = vpop.eup %1147 }
 0x343   : > { %v755_v3 = vsel %vm358_vm2, %v1148_v2, 0.0 }
 0x345   : > { %529 = vrot.lane.b32.xlu1 %v1524_v9, %s1316_s11  ;;  %s1215_s11 = scalar_lea.vmem %s1593_s29, 128 }
 0x346   : > { %p1216_p6 = scmp.ne.s32.totalorder %s1593_s29, %s1215_s11 }
 0x348   : > { %p1217_p8 = pnand %p1216_p6, %p1445_p10 }
 0x34a   : > { %p1218_p12 = pneg %p1217_p8 }
 0x352   : > { %417 = vrot.lane.b32.xlu0 %v1524_v9, %s1317_s7  ;;  %s1219_s7 = sshll.u32 %s1323_s18, 4  ;;  %s1220_s7 = int_to_ptr.vmem [resolvable:$false] %s1219_s7 }
 0x353   : > { %p1222_p11 = scmp.lt.s32.totalorder %s1593_s29, %s1220_s7 }
 0x356   : > { %761 = vrot.lane.b32.xlu0 %v1524_v9, %s1318_s23  ;;  %s1221_s23 = scalar_lea.vmem %s1220_s7, 256 }
 0x357   : > { %p1223_p0 = scmp.lt.s32.totalorder %s1221_s23, %s1215_s11 }
 0x359   : > { %p1224_p5 = por %p1223_p0, %p1222_p11 }
 0x35b   : > { %p1225_p9 = pnand %p1224_p5, %p1218_p12 }
 0x369   : > { %756 = vadd.xlane.f32.xlu1 %v755_v3 }
 0x37a   : > { %645 = vrot.lane.b32.xlu1 %v1524_v9, %s1319_s25 }
 0x3b9   : > { %v413_v4 = vpop.xlane.xlu0 %412 }
 0x3ba   : > { %1149 = vrcp.f32 %v413_v4 }
 0x3c1   : > { %v525_v5 = vpop.xlane.xlu1 %524 }
 0x3c2   : > { %1151 = vrcp.f32 %v525_v5 }
 0x3c4   : > { %v1150_v6 = vpop.eup %1149 }
 0x3c5   : > { %v415_v8 = vmul.f32 %v1150_v6, %v1142_v53  ;;  %v530_v12 = vpop.permute.xlu1 %529 }
 0x3c6   : > { %v535_v15 = vsel %vm422_vm3, %v530_v12, 0 }
 0x3c7   : > { %v416_v13 = vpack.c.bf16 %v415_v8, %v415_v8 }
 0x3c9   : > { %v641_v7 = vpop.xlane.xlu0 %640 }
 0x3ca   : > { %1153 = vrcp.f32 %v641_v7 }
 0x3cc   : > { %v1152_v14 = vpop.eup %1151 }
 0x3cd   : > { %v418_v10 = vpop.permute.xlu0 %417  ;;  %v527_v9 = vmul.f32 %v1152_v14, %v1144_v58 }
 0x3ce   : > { %v424_v11 = vsel %vm422_vm3, %v418_v10, 0 }
 0x3cf   : > { %1007 = vmatpush3.bf16.msra.mxu0 %v424_v11  ;;  %v528_v16 = vpack.c.bf16 %v527_v9, %v527_v9 }
 0x3d0   : > { %1018 = vmatprep.subr.bf16.mxu0 %v1307_v0 }
 0x3d1   : > { %v762_v22 = vpop.permute.xlu0 %761 }
 0x3d2   : > { %1009 = vmatmul.mubr.msk.bf16.vlgmr.msra.gmra.mrb[4].mxu0 %vm358_vm2, %v416_v13  ;;  %v767_v24 = vsel %vm422_vm3, %v762_v22, 0 }
 0x3d3   : > { %1019 = vmatpush3.bf16.msra.mxu0 %v535_v15  ;;  %1020 = vmatprep.mubr.msk.bf16.mxu0 %vm1308_vm0, %v1307_v0 }
 0x3d4   : > { %1030 = vmatprep.subr.bf16.mxu0 %v1307_v0  ;;  %v1154_v17 = vpop.eup %1153 }
 0x3d5   : > { %v643_v19 = vmul.f32 %v1154_v17, %v1146_v60 }
 0x3d7   : > { %v644_v23 = vpack.c.bf16 %v643_v19, %v643_v19 }
 0x3da   : > { %1021 = vmatmul.mubr.msk.bf16.vlgmr.msra.gmra.mrb[8].mxu0 %vm358_vm2, %v528_v16 }
 0x3db   : > { %1032 = vmatprep.mubr.msk.bf16.mxu0 %vm1308_vm0, %v1307_v0 }
 0x3f6   : > { %v757_v18 = vpop.xlane.xlu1 %756 }
 0x3f7   : > { %1155 = vrcp.f32 %v757_v18 }
 0x3fa   : > { %v646_v20 = vpop.permute.xlu1 %645 }
 0x3fb   : > { %v651_v21 = vsel %vm422_vm3, %v646_v20, 0 }
 0x3fc   : > { %1031 = vmatpush3.bf16.msra.mxu0 %v651_v21 }
 0x3fd   : > { %1042 = vmatprep.subr.bf16.mxu0 %v1307_v0 }
 0x3ff   : > { %1033 = vmatmul.mubr.msk.bf16.vlgmr.msra.gmra.mrb[12].mxu0 %vm358_vm2, %v644_v23 }
 0x400   : > { %1043 = vmatpush3.bf16.msra.mxu0 %v767_v24  ;;  %1044 = vmatprep.mubr.msk.bf16.mxu0 %vm1308_vm0, %v1307_v0 }
 0x401   : > { %v1156_v25 = vpop.eup %1155 }
 0x402   : > { %v759_v26 = vmul.f32 %v1156_v25, %v1148_v2 }
 0x404   : > { %v760_v27 = vpack.c.bf16 %v759_v26, %v759_v26 }
 0x407   : > { %1045 = vmatmul.mubr.msk.bf16.vlgmr.msra.gmra.mrb[16].mxu0 %vm358_vm2, %v760_v27 }
 0x4a5   : > { %v460_v28 = vpop.f32.mrb[4].mxu0 }
 0x4a6   : > { %466 = vst.msk [vmem:[#allocation2] sm:$0xff] %vm358_vm2, %v460_v28  ;;  %v1010_v29 = vpop.f32.mrb[5].mxu0 }
 0x4a7   : > { %v463_v30 = vpop.f32.mrb[6].mxu0 }
 0x4a8   : > { %v1011_v31 = vpop.f32.mrb[7].mxu0 }
 0x4ad   : > { %v571_v32 = vpop.f32.mrb[8].mxu0 }
 0x4ae   : > { %578 = vrot.lane.b32.xlu1 %v571_v32, %s1320_s27  ;;  %v1022_v33 = vpop.f32.mrb[9].mxu0 }
 0x4af   : > { %v574_v34 = vpop.f32.mrb[10].mxu0 }
 0x4b0   : > { %v1023_v35 = vpop.f32.mrb[11].mxu0 }
 0x4d2   : > { %v687_v36 = vpop.f32.mrb[12].mxu0 }
 0x4d3   : > { %694 = vrot.lane.b32.xlu0 %v687_v36, %s1321_s14  ;;  %v1034_v0 = vpop.f32.mrb[13].mxu0 }
 0x4d4   : > { %v690_v37 = vpop.f32.mrb[14].mxu0 }
 0x4d5   : > { %v1035_v38 = vpop.f32.mrb[15].mxu0 }
 0x4da   : > { %v803_v39 = vpop.f32.mrb[16].mxu0 }
 0x4db   : > { %810 = vrot.lane.b32.xlu1 %v803_v39, %s1322_s21  ;;  %v1046_v40 = vpop.f32.mrb[17].mxu0 }
 0x4dc   : > { %v806_v41 = vpop.f32.mrb[18].mxu0 }
 0x4dd   : > { %v1047_v42 = vpop.f32.mrb[19].mxu0 }
 0x520   : > { %v579_v43 = vpop.permute.xlu1 %578 }
 0x521   : > { %582 = vst.msk [vmem:[#allocation2] sm:$0xff] %vm581_vm4, %v579_v43 }
 0x545   : > { %v695_v44 = vpop.permute.xlu0 %694 }
 0x546   : > { %698 = vst.msk [vmem:[#allocation2] sm:$0xff] %vm697_vm5, %v695_v44 }
 0x54d   : > { %v811_v45 = vpop.permute.xlu1 %810 }
 0x54e   : > { %814 = vst.msk [vmem:[#allocation2] sm:$0xff] %vm813_vm6, %v811_v45 }
 0x555   : > { %v815_v46 = vld [vmem:[#allocation2] sm:$0xff] }
 0x556   : > { %816 = vst.msk [vmem:[%s271_s12] sm:$0xff] %vm303_vm1, %v815_v46 }
 0x557   : > { %1228 = shalt.err (!%p1225_p9)
}
 0x558   : > { %s1229_s6 = scalar_lea.hbm %s1591_s30, 128  ;;  %s1233_s14 = scalar_lea.hbm %s1645_s4, 256 }
 0x559   : > { %p1230_p1 = scmp.ne.s32.totalorder %s1591_s30, %s1229_s6  ;;  %p1234_p3 = scmp.lt.u32.totalorder %s1591_s30, %s1645_s4 }
 0x55a   : > { %p1235_p4 = scmp.lt.u32.totalorder %s1233_s14, %s1229_s6  ;;  %p1237_p6 = scmp.lt.u32.totalorder %s1229_s6, %s1591_s30 }
 0x55b   : > { %p1231_p2 = pnand %p1230_p1, %p1445_p10 }
 0x55c   : > { %p1236_p13 = por %p1235_p4, %p1234_p3 }
 0x55d   : > { %p1232_p7 = pneg %p1231_p2 }
 0x55e   : > { %p1238_p8 = por %p1237_p6, %p1236_p13 }
 0x560   : > { %p1239_p12 = pnand %p1238_p8, %p1232_p7 }
 0x562   : > { %1242 = shalt.err (!%p1239_p12)
}
 0x563   : > { %1054 = dma.vmem_to_hbm [thread:$0]  (%p1445_p10), %s1593_s29, 128, %s1591_s30, %s818_s9  }
 0x564 PF: > { %s844_s28 = sand.u32 1, %s1281_s15   ;;  %p1663_p11 = scmp.ne.s32.totalorder %s1653_s26, 0 }
 0x565   : > { %p1664_p0 = scmp.ge.s32.totalorder %s1301_s20, 2  ;;  %s845_s12 = scalar_lea.sflag [#allocation5], %s844_s28 }
 0x567   : > { %p1065_p5 = pnand %p1664_p0, %p1663_p11 }
 0x569   : > { %1276 = dma.done.wait (!%p1065_p5), %s845_s12, 128  }
 0x56a   : > { %1278 = vsyncadd (!%p1065_p5), %s845_s12, 4294967168  ;;  %s21_s20 = sadd.s32 1, %s1301_s20   ;;  %s1665_s15 = smov %s1285_s16 }
 0x56b   : > { %p18_p9 = scmp.ge.s32.totalorder %s21_s20, 4   ;;  %s1666_s16 = smov %s1289_s17 }
 0x56c   : > { %s1667_s17 = smov %s1454_s10  ;;  %s1668_s18 = smov %s1297_s19 }
 0x56d   : > { %s1669_s19 = smov %s1671_s5  ;;  %20 = sbr.rel (!%p18_p9) target bundleno = 7 (0x7), region = 92 }
 0x574   :  { %850 = vsyncpa [#allocation4], 1 }
 0x575   :  { %852 = vsyncpa [#allocation4 + $0x1], 1 }
 0x576   :  { %853 = vsyncpa [#allocation7], 1 }
 0x577   :  { %854 = vsyncpa [#allocation5], 1 }
 0x578   :  { %856 = vsyncpa [#allocation5 + $0x1], 1 }

</bundles_post_ra>
